<compile_context>
chip_gen: v7x
topology: tpu7x:2x2x1
jax: 0.10.0
libtpu: 0.0.40
codegen_flags: <defaults>
</compile_context>

<pallas_src>
import functools

import jax
import jax.numpy as jnp
from jax.experimental import pallas as pl
from jax.experimental.pallas import tpu as pltpu


def _round_up(x, m):
    return ((x + m - 1) // m) * m


def _cdiv(a, b):
    return -(-a // b)


# ------------------------------ Pallas kernels ------------------------------ #
def _gconv_kernel(x_ref, w_ref, b_ref, o_ref, *, n_taps, tile_t, negative_slope):
    """One (group, batch, time-tile) step of a grouped Conv1d (+ optional LeakyReLU).

    x_ref: (C_in_g*stride, tile_t + n_taps - 1)  bf16  phase-folded input window (halo)
    w_ref: (n_taps, C_out_g, C_in_g*stride)      bf16  per-tap weight slabs
    b_ref: (C_out_g, 1)                          f32
    o_ref: (C_out_g, tile_t)                     f32
    """
    # Bias folded into the accumulator init (saves a separate VPU add pass).
    acc = jnp.broadcast_to(b_ref[...], o_ref.shape).astype(jnp.float32)
    for q in range(n_taps):  # static unrolled tap loop, f32 accumulation on MXU
        acc = acc + jnp.dot(w_ref[q], x_ref[:, q:q + tile_t],
                            preferred_element_type=jnp.float32)
    if negative_slope is not None:  # fused LeakyReLU (static flag)
        acc = jnp.where(acc >= 0.0, acc, jnp.float32(negative_slope) * acc)
    o_ref[...] = acc.astype(o_ref.dtype)


def _avgpool_kernel(x_ref, o_ref, *, tile_t):
    """AvgPool1d(4, 2, 2), count_include_pad=True, as a pure VPU kernel.

    x_ref: (C, 2, tile_t + 1)  f32  (phase-folded, 1-element halo)
    o_ref: (C, tile_t)         f32
    """
    xv = x_ref[...]
    o_ref[...] = 0.25 * (xv[:, 0, :tile_t] + xv[:, 1, :tile_t] +
                         xv[:, 0, 1:tile_t + 1] + xv[:, 1, 1:tile_t + 1])


# ------------------------------ Conv wrapper -------------------------------- #
def _choose_tile_t(t_out, cr, c_out_g, n_taps, budget_bytes=8 << 20, max_tile=2048):
    """Lane-dense (multiple of 128) time tile that fits the VMEM budget on all gens
    (budget sized well under v5e's 16 MiB scoped default and v7x's 32 MiB)."""
    tile = min(_round_up(max(t_out, 1), 128), max_tile)
    while tile > 128:
        win = tile + n_taps - 1
        need = 2 * (cr * win * 2 + c_out_g * tile * 4)           # dbl-buffered act/out
        need += 2 * (n_taps * c_out_g * cr * 2 + c_out_g * 4)    # weights + bias
        if need <= budget_bytes:
            break
        tile -= 128
    return tile


def conv1d_grouped(x, w, b, *, stride, padding, groups, negative_slope=None):
    """Grouped Conv1d (+ optional LeakyReLU).  x:(B,C_in,T)  w:(C_out,C_in/g,K)  b:(C_out,)"""
    B, C_in, T = x.shape
    C_out, C_in_g, K = w.shape
    assert C_in == C_in_g * groups and C_out % groups == 0
    C_out_g = C_out // groups
    T_out = (T + 2 * padding - K) // stride + 1
    Q = _cdiv(K, stride)          # taps per phase group (in-kernel matmul count)
    CR = C_in_g * stride          # contraction rows per tap (phase-folded)

    tile_t = _choose_tile_t(T_out, CR, C_out_g, Q)
    n_tiles = _cdiv(T_out, tile_t)
    T_out_pad = n_tiles * tile_t
    win = tile_t + Q - 1

    # ---- host-side glue: pad + phase-fold + halo-tile (≈1x data, no K-fold im2col) ----
    L_req = (T_out_pad + Q - 1) * stride
    right = max(padding, L_req - padding - T)
    x_pad = jnp.pad(x, ((0, 0), (0, 0), (padding, right)))
    t_base = (jnp.arange(n_tiles) * tile_t)[:, None, None]
    p_off = jnp.arange(stride)[None, :, None]
    j_off = jnp.arange(win)[None, None, :]
    pos = (t_base + j_off) * stride + p_off                     # (n_tiles, stride, win)
    a = x_pad[:, :, pos]                                        # (B, C_in, n_tiles, stride, win)
    a = a.reshape(B, groups, C_in_g, n_tiles, stride, win)
    a = jnp.transpose(a, (0, 1, 3, 2, 4, 5))                    # (B, G, nt, C_in_g, s, win)
    a = a.reshape(B, groups, n_tiles, CR, win).astype(jnp.bfloat16)

    # ---- weights: per-tap (C_out_g, C_in_g*stride) slabs, zero-padded past K ----
    w_g = w.reshape(groups, C_out_g, C_in_g, K)
    w_g = jnp.pad(w_g, ((0, 0), (0, 0), (0, 0), (0, Q * stride - K)))
    w_g = w_g.reshape(groups, C_out_g, C_in_g, Q, stride)
    w_q = jnp.transpose(w_g, (0, 3, 1, 2, 4)).reshape(groups, Q, C_out_g, CR)
    w_q = w_q.astype(jnp.bfloat16)
    b_r = b.reshape(groups, C_out_g, 1).astype(jnp.float32)

    kernel = functools.partial(_gconv_kernel, n_taps=Q, tile_t=tile_t,
                               negative_slope=negative_slope)
    flops = 2 * B * groups * C_out_g * CR * Q * T_out_pad
    bytes_accessed = (a.size * 2 + w_q.size * 2 + b_r.size * 4
                      + B * C_out * T_out_pad * 4)

    out = pl.pallas_call(
        kernel,
        out_shape=jax.ShapeDtypeStruct((B, groups, C_out_g, T_out_pad), jnp.float32),
        grid=(groups, B, n_tiles),  # groups outermost -> weight block stays resident
        in_specs=[
            pl.BlockSpec((None, None, None, CR, win),
                         lambda g, bi, t: (bi, g, t, 0, 0)),
            pl.BlockSpec((None, Q, C_out_g, CR),
                         lambda g, bi, t: (g, 0, 0, 0)),
            pl.BlockSpec((None, C_out_g, 1),
                         lambda g, bi, t: (g, 0, 0)),
        ],
        out_specs=pl.BlockSpec((None, None, C_out_g, tile_t),
                               lambda g, bi, t: (bi, g, 0, t)),
        compiler_params=pltpu.CompilerParams(
            dimension_semantics=("parallel", "parallel", "parallel")),
        cost_estimate=pl.CostEstimate(flops=flops, transcendentals=0,
                                      bytes_accessed=bytes_accessed),
    )(a, w_q, b_r)
    out = out.reshape(B, C_out, T_out_pad)
    return out[:, :, :T_out]


# ------------------------------ AvgPool wrapper ------------------------------ #
def avg_pool1d_4_2_2(x):
    """nn.AvgPool1d(4, 2, 2) (count_include_pad=True) as a VPU Pallas kernel."""
    B, C, T = x.shape
    K, stride, padding = 4, 2, 2
    T_out = (T + 2 * padding - K) // stride + 1
    tile_t = min(_round_up(T_out, 128), 2048)
    n_tiles = _cdiv(T_out, tile_t)
    T_out_pad = n_tiles * tile_t
    win = tile_t + 1

    L_req = (T_out_pad + 1) * stride
    right = max(padding, L_req - padding - T)
    x_pad = jnp.pad(x, ((0, 0), (0, 0), (padding, right)))
    t_base = (jnp.arange(n_tiles) * tile_t)[:, None, None]
    p_off = jnp.arange(stride)[None, :, None]
    j_off = jnp.arange(win)[None, None, :]
    pos = (t_base + j_off) * stride + p_off                     # (n_tiles, 2, win)
    a = x_pad[:, :, pos]                                        # (B, C, n_tiles, 2, win)

    kernel = functools.partial(_avgpool_kernel, tile_t=tile_t)
    out = pl.pallas_call(
        kernel,
        out_shape=jax.ShapeDtypeStruct((B, C, T_out_pad), jnp.float32),
        grid=(B, n_tiles),
        in_specs=[pl.BlockSpec((None, C, None, 2, win),
                               lambda bi, t: (bi, 0, t, 0, 0))],
        out_specs=pl.BlockSpec((None, C, tile_t), lambda bi, t: (bi, 0, t)),
        compiler_params=pltpu.CompilerParams(
            dimension_semantics=("parallel", "parallel")),
    )(a)
    return out[:, :, :T_out]


# -------------------------------- Model glue --------------------------------- #
def init_scale_disc(key, in_channels, out_channels, kernels, groups):
    params = []
    for in_c, out_c, k, g in zip(in_channels, out_channels, kernels, groups):
        key, k1, k2 = jax.random.split(key, 3)
        w = jax.random.normal(k1, (out_c, in_c // g, k), jnp.float32) * 0.1
        b = jax.random.normal(k2, (out_c,), jnp.float32) * 0.01
        params.append((w, b))
    return params, key


def _scale_forward(params, x, strides, paddings, groups, relu_coef):
    tmp = []
    n = len(params)
    for i, (w, b) in enumerate(params):
        ns = None if i == n - 1 else relu_coef  # last conv has no LeakyReLU
        x = conv1d_grouped(x, w, b, stride=strides[i], padding=paddings[i],
                           groups=groups[i], negative_slope=ns)
        tmp.append(x)
    return x, tmp


def msd_forward(discs, gt_audio, pr_audio, *, strides, paddings, groups, relu_coef):
    B = gt_audio.shape[0]
    # Fuse gt/pr through shared weights: one pallas_call per layer instead of two.
    audio = jnp.concatenate([gt_audio, pr_audio], axis=0)
    gt_finals, pr_finals, gt_states, pr_states = [], [], [], []
    for si, params in enumerate(discs):
        if si > 0:
            audio = avg_pool1d_4_2_2(audio)
        fin, tmp = _scale_forward(params, audio, strides, paddings, groups, relu_coef)
        gt_states.append([t[:B] for t in tmp])
        pr_states.append([t[B:] for t in tmp])
        gt_finals.append(fin[:B])
        pr_finals.append(fin[B:])
    return gt_finals, pr_finals, gt_states, pr_states


class MultiScaleDiscriminator:
    kReluCoef = 0.1

    def __init__(self, key, in_channels, out_channels, kernels, strides, paddings, groups):
        self.strides = tuple(strides)
        self.paddings = tuple(paddings)
        self.groups = tuple(groups)
        self.discs = []
        for _ in range(3):
            p, key = init_scale_disc(key, in_channels, out_channels, kernels, groups)
            self.discs.append(p)
        # TODO(synk): spectral_norm / weight_norm are weight *re-parametrizations*;
        # with synthetic weights the forward reduces to the plain conv weight used here.
        self._fwd = jax.jit(functools.partial(
            msd_forward, strides=self.strides, paddings=self.paddings,
            groups=self.groups, relu_coef=self.kReluCoef))

    def __call__(self, gt_audio, pr_audio):
        return self._fwd(self.discs, gt_audio, pr_audio)


# ----------------------------------- Main ------------------------------------ #
if __name__ == "__main__":
    key = jax.random.PRNGKey(0)
    k_gt, k_pr, k_params = jax.random.split(key, 3)

    B, T = 2, 64
    gt_audio = jax.random.normal(k_gt, (B, 1, T), jnp.float32)
    pr_audio = jax.random.normal(k_pr, (B, 1, T), jnp.float32)

    # Small synthetic config (mirrors the module's __init__ argument lists).
    in_channels  = [1, 4, 8, 8]
    out_channels = [4, 8, 8, 1]
    kernels      = [5, 5, 5, 3]
    strides      = [2, 2, 1, 1]
    paddings     = [2, 2, 2, 1]
    groups       = [1, 2, 2, 1]

    msd = MultiScaleDiscriminator(k_params, in_channels, out_channels, kernels,
                                  strides, paddings, groups)
    gt_finals, pr_finals, gt_states, pr_states = msd(gt_audio, pr_audio)

    jax.block_until_ready(gt_finals)
    jax.block_until_ready(pr_finals)
    jax.block_until_ready(gt_states)
    jax.block_until_ready(pr_states)
    print("KERNEL_OK")
</pallas_src>

<mosaic_0001>
module attributes {stable_mosaic.version = 11 : i64} {
  func.func @_gconv_kernel(%arg0: i32, %arg1: i32, %arg2: i32, %arg3: memref<1x1x1x2x130xbf16, #tpu.memory_space<vmem>>, %arg4: memref<1x3x4x2xbf16, #tpu.memory_space<vmem>>, %arg5: memref<1x4x1xf32, #tpu.memory_space<vmem>>, %arg6: memref<1x1x4x128xf32, #tpu.memory_space<vmem>>) attributes {dimension_semantics = [#tpu.dimension_semantics<parallel>, #tpu.dimension_semantics<parallel>, #tpu.dimension_semantics<parallel>], iteration_bounds = array<i64: 1, 4, 1>, scalar_prefetch = 0 : i64, scratch_operands = 0 : i64, tpu.core_type = #tpu.core_type<tc>, window_params = [{transform_indices = @transform_0, window_bounds = array<i64: 1, 1, 1, 2, 130>}, {transform_indices = @transform_1, window_bounds = array<i64: 1, 3, 4, 2>}, {transform_indices = @transform_2, window_bounds = array<i64: 1, 4, 1>}, {transform_indices = @transform_3, window_bounds = array<i64: 1, 1, 4, 128>}]} {
    %c0 = arith.constant 0 : index
    %c0_0 = arith.constant 0 : index
    %c0_1 = arith.constant 0 : index
    %0 = vector.load %arg5[%c0, %c0_0, %c0_1] : memref<1x4x1xf32, #tpu.memory_space<vmem>>, vector<1x4x1xf32>
    %1 = vector.shape_cast %0 : vector<1x4x1xf32> to vector<4x1xf32>
    %2 = vector.shape_cast %1 : vector<4x1xf32> to vector<4x1xf32>
    %3 = vector.broadcast %2 : vector<4x1xf32> to vector<4x128xf32>
    %c0_2 = arith.constant 0 : index
    %c0_3 = arith.constant 0 : index
    %c0_4 = arith.constant 0 : index
    %c0_5 = arith.constant 0 : index
    %4 = vector.load %arg4[%c0_2, %c0_3, %c0_4, %c0_5] : memref<1x3x4x2xbf16, #tpu.memory_space<vmem>>, vector<1x1x4x2xbf16>
    %5 = vector.shape_cast %4 : vector<1x1x4x2xbf16> to vector<4x2xbf16>
    %c0_6 = arith.constant 0 : index
    %c0_7 = arith.constant 0 : index
    %c0_8 = arith.constant 0 : index
    %c0_9 = arith.constant 0 : index
    %c0_10 = arith.constant 0 : index
    %6 = vector.load %arg3[%c0_6, %c0_7, %c0_8, %c0_9, %c0_10] : memref<1x1x1x2x130xbf16, #tpu.memory_space<vmem>>, vector<1x1x1x2x128xbf16>
    %7 = vector.shape_cast %6 : vector<1x1x1x2x128xbf16> to vector<2x128xbf16>
    %cst = arith.constant dense<0.000000e+00> : vector<4x128xf32>
    %8 = tpu.matmul %5, %7, %cst {dimension_numbers = #tpu.dot_dimension_numbers<[1], [0], [0], [1], [0, 0, 1, 1], [], []>} : vector<4x2xbf16>, vector<2x128xbf16>, vector<4x128xf32> -> vector<4x128xf32>
    %9 = arith.addf %3, %8 : vector<4x128xf32>
    %c0_11 = arith.constant 0 : index
    %c1 = arith.constant 1 : index
    %c0_12 = arith.constant 0 : index
    %c0_13 = arith.constant 0 : index
    %10 = vector.load %arg4[%c0_11, %c1, %c0_12, %c0_13] : memref<1x3x4x2xbf16, #tpu.memory_space<vmem>>, vector<1x1x4x2xbf16>
    %11 = vector.shape_cast %10 : vector<1x1x4x2xbf16> to vector<4x2xbf16>
    %c0_14 = arith.constant 0 : index
    %c0_15 = arith.constant 0 : index
    %c0_16 = arith.constant 0 : index
    %c0_17 = arith.constant 0 : index
    %c1_18 = arith.constant 1 : index
    %12 = vector.load %arg3[%c0_14, %c0_15, %c0_16, %c0_17, %c1_18] : memref<1x1x1x2x130xbf16, #tpu.memory_space<vmem>>, vector<1x1x1x2x128xbf16>
    %13 = vector.shape_cast %12 : vector<1x1x1x2x128xbf16> to vector<2x128xbf16>
    %cst_19 = arith.constant dense<0.000000e+00> : vector<4x128xf32>
    %14 = tpu.matmul %11, %13, %cst_19 {dimension_numbers = #tpu.dot_dimension_numbers<[1], [0], [0], [1], [0, 0, 1, 1], [], []>} : vector<4x2xbf16>, vector<2x128xbf16>, vector<4x128xf32> -> vector<4x128xf32>
    %15 = arith.addf %9, %14 : vector<4x128xf32>
    %c0_20 = arith.constant 0 : index
    %c2 = arith.constant 2 : index
    %c0_21 = arith.constant 0 : index
    %c0_22 = arith.constant 0 : index
    %16 = vector.load %arg4[%c0_20, %c2, %c0_21, %c0_22] : memref<1x3x4x2xbf16, #tpu.memory_space<vmem>>, vector<1x1x4x2xbf16>
    %17 = vector.shape_cast %16 : vector<1x1x4x2xbf16> to vector<4x2xbf16>
    %c0_23 = arith.constant 0 : index
    %c0_24 = arith.constant 0 : index
    %c0_25 = arith.constant 0 : index
    %c0_26 = arith.constant 0 : index
    %c2_27 = arith.constant 2 : index
    %18 = vector.load %arg3[%c0_23, %c0_24, %c0_25, %c0_26, %c2_27] : memref<1x1x1x2x130xbf16, #tpu.memory_space<vmem>>, vector<1x1x1x2x128xbf16>
    %19 = vector.shape_cast %18 : vector<1x1x1x2x128xbf16> to vector<2x128xbf16>
    %cst_28 = arith.constant dense<0.000000e+00> : vector<4x128xf32>
    %20 = tpu.matmul %17, %19, %cst_28 {dimension_numbers = #tpu.dot_dimension_numbers<[1], [0], [0], [1], [0, 0, 1, 1], [], []>} : vector<4x2xbf16>, vector<2x128xbf16>, vector<4x128xf32> -> vector<4x128xf32>
    %21 = arith.addf %15, %20 : vector<4x128xf32>
    %cst_29 = arith.constant 0.000000e+00 : f32
    %22 = vector.broadcast %cst_29 : f32 to vector<4x128xf32>
    %23 = arith.cmpf oge, %21, %22 : vector<4x128xf32>
    %cst_30 = arith.constant 1.000000e-01 : f32
    %24 = vector.broadcast %cst_30 : f32 to vector<4x128xf32>
    %25 = arith.mulf %24, %21 : vector<4x128xf32>
    %26 = arith.select %23, %21, %25 : vector<4x128xi1>, vector<4x128xf32>
    %c0_31 = arith.constant 0 : index
    %c0_32 = arith.constant 0 : index
    %c0_33 = arith.constant 0 : index
    %c0_34 = arith.constant 0 : index
    %27 = vector.load %arg6[%c0_31, %c0_32, %c0_33, %c0_34] : memref<1x1x4x128xf32, #tpu.memory_space<vmem>>, vector<1x1x4x128xf32>
    %28 = vector.shape_cast %27 : vector<1x1x4x128xf32> to vector<4x128xf32>
    %29 = vector.shape_cast %26 : vector<4x128xf32> to vector<1x1x4x128xf32>
    tpu.vector_store %arg6[%c0_31, %c0_32, %c0_33, %c0_34], %29 {strides = array<i32>} : memref<1x1x4x128xf32, #tpu.memory_space<vmem>>, vector<1x1x4x128xf32>,
    return
  }
  func.func @transform_0(%arg0: i32, %arg1: i32, %arg2: i32) -> (i32, i32, i32, i32, i32) {
    %c0_i32 = arith.constant 0 : i32
    %c0_i32_0 = arith.constant 0 : i32
    %c0_i32_1 = arith.constant 0 : i32
    return %arg1, %arg0, %arg2, %c0_i32, %c0_i32_0 : i32, i32, i32, i32, i32
  }
  func.func @transform_1(%arg0: i32, %arg1: i32, %arg2: i32) -> (i32, i32, i32, i32) {
    %c0_i32 = arith.constant 0 : i32
    %c0_i32_0 = arith.constant 0 : i32
    %c0_i32_1 = arith.constant 0 : i32
    %c0_i32_2 = arith.constant 0 : i32
    return %arg0, %c0_i32, %c0_i32_0, %c0_i32_1 : i32, i32, i32, i32
  }
  func.func @transform_2(%arg0: i32, %arg1: i32, %arg2: i32) -> (i32, i32, i32) {
    %c0_i32 = arith.constant 0 : i32
    %c0_i32_0 = arith.constant 0 : i32
    %c0_i32_1 = arith.constant 0 : i32
    return %arg0, %c0_i32, %c0_i32_0 : i32, i32, i32
  }
  func.func @transform_3(%arg0: i32, %arg1: i32, %arg2: i32) -> (i32, i32, i32, i32) {
    %c0_i32 = arith.constant 0 : i32
    %c0_i32_0 = arith.constant 0 : i32
    return %arg1, %arg0, %c0_i32, %arg2 : i32, i32, i32, i32
  }
}

module attributes {stable_mosaic.version = 11 : i64} {
  func.func @_gconv_kernel(%arg0: i32, %arg1: i32, %arg2: i32, %arg3: memref<1x1x1x4x130xbf16, #tpu.memory_space<vmem>>, %arg4: memref<1x3x4x4xbf16, #tpu.memory_space<vmem>>, %arg5: memref<1x4x1xf32, #tpu.memory_space<vmem>>, %arg6: memref<1x1x4x128xf32, #tpu.memory_space<vmem>>) attributes {dimension_semantics = [#tpu.dimension_semantics<parallel>, #tpu.dimension_semantics<parallel>, #tpu.dimension_semantics<parallel>], iteration_bounds = array<i64: 2, 4, 1>, scalar_prefetch = 0 : i64, scratch_operands = 0 : i64, tpu.core_type = #tpu.core_type<tc>, window_params = [{transform_indices = @transform_0, window_bounds = array<i64: 1, 1, 1, 4, 130>}, {transform_indices = @transform_1, window_bounds = array<i64: 1, 3, 4, 4>}, {transform_indices = @transform_2, window_bounds = array<i64: 1, 4, 1>}, {transform_indices = @transform_3, window_bounds = array<i64: 1, 1, 4, 128>}]} {
    %c0 = arith.constant 0 : index
    %c0_0 = arith.constant 0 : index
    %c0_1 = arith.constant 0 : index
    %0 = vector.load %arg5[%c0, %c0_0, %c0_1] : memref<1x4x1xf32, #tpu.memory_space<vmem>>, vector<1x4x1xf32>
    %1 = vector.shape_cast %0 : vector<1x4x1xf32> to vector<4x1xf32>
    %2 = vector.shape_cast %1 : vector<4x1xf32> to vector<4x1xf32>
    %3 = vector.broadcast %2 : vector<4x1xf32> to vector<4x128xf32>
    %c0_2 = arith.constant 0 : index
    %c0_3 = arith.constant 0 : index
    %c0_4 = arith.constant 0 : index
    %c0_5 = arith.constant 0 : index
    %4 = vector.load %arg4[%c0_2, %c0_3, %c0_4, %c0_5] : memref<1x3x4x4xbf16, #tpu.memory_space<vmem>>, vector<1x1x4x4xbf16>
    %5 = vector.shape_cast %4 : vector<1x1x4x4xbf16> to vector<4x4xbf16>
    %c0_6 = arith.constant 0 : index
    %c0_7 = arith.constant 0 : index
    %c0_8 = arith.constant 0 : index
    %c0_9 = arith.constant 0 : index
    %c0_10 = arith.constant 0 : index
    %6 = vector.load %arg3[%c0_6, %c0_7, %c0_8, %c0_9, %c0_10] : memref<1x1x1x4x130xbf16, #tpu.memory_space<vmem>>, vector<1x1x1x4x128xbf16>
    %7 = vector.shape_cast %6 : vector<1x1x1x4x128xbf16> to vector<4x128xbf16>
    %cst = arith.constant dense<0.000000e+00> : vector<4x128xf32>
    %8 = tpu.matmul %5, %7, %cst {dimension_numbers = #tpu.dot_dimension_numbers<[1], [0], [0], [1], [0, 0, 1, 1], [], []>} : vector<4x4xbf16>, vector<4x128xbf16>, vector<4x128xf32> -> vector<4x128xf32>
    %9 = arith.addf %3, %8 : vector<4x128xf32>
    %c0_11 = arith.constant 0 : index
    %c1 = arith.constant 1 : index
    %c0_12 = arith.constant 0 : index
    %c0_13 = arith.constant 0 : index
    %10 = vector.load %arg4[%c0_11, %c1, %c0_12, %c0_13] : memref<1x3x4x4xbf16, #tpu.memory_space<vmem>>, vector<1x1x4x4xbf16>
    %11 = vector.shape_cast %10 : vector<1x1x4x4xbf16> to vector<4x4xbf16>
    %c0_14 = arith.constant 0 : index
    %c0_15 = arith.constant 0 : index
    %c0_16 = arith.constant 0 : index
    %c0_17 = arith.constant 0 : index
    %c1_18 = arith.constant 1 : index
    %12 = vector.load %arg3[%c0_14, %c0_15, %c0_16, %c0_17, %c1_18] : memref<1x1x1x4x130xbf16, #tpu.memory_space<vmem>>, vector<1x1x1x4x128xbf16>
    %13 = vector.shape_cast %12 : vector<1x1x1x4x128xbf16> to vector<4x128xbf16>
    %cst_19 = arith.constant dense<0.000000e+00> : vector<4x128xf32>
    %14 = tpu.matmul %11, %13, %cst_19 {dimension_numbers = #tpu.dot_dimension_numbers<[1], [0], [0], [1], [0, 0, 1, 1], [], []>} : vector<4x4xbf16>, vector<4x128xbf16>, vector<4x128xf32> -> vector<4x128xf32>
    %15 = arith.addf %9, %14 : vector<4x128xf32>
    %c0_20 = arith.constant 0 : index
    %c2 = arith.constant 2 : index
    %c0_21 = arith.constant 0 : index
    %c0_22 = arith.constant 0 : index
    %16 = vector.load %arg4[%c0_20, %c2, %c0_21, %c0_22] : memref<1x3x4x4xbf16, #tpu.memory_space<vmem>>, vector<1x1x4x4xbf16>
    %17 = vector.shape_cast %16 : vector<1x1x4x4xbf16> to vector<4x4xbf16>
    %c0_23 = arith.constant 0 : index
    %c0_24 = arith.constant 0 : index
    %c0_25 = arith.constant 0 : index
    %c0_26 = arith.constant 0 : index
    %c2_27 = arith.constant 2 : index
    %18 = vector.load %arg3[%c0_23, %c0_24, %c0_25, %c0_26, %c2_27] : memref<1x1x1x4x130xbf16, #tpu.memory_space<vmem>>, vector<1x1x1x4x128xbf16>
    %19 = vector.shape_cast %18 : vector<1x1x1x4x128xbf16> to vector<4x128xbf16>
    %cst_28 = arith.constant dense<0.000000e+00> : vector<4x128xf32>
    %20 = tpu.matmul %17, %19, %cst_28 {dimension_numbers = #tpu.dot_dimension_numbers<[1], [0], [0], [1], [0, 0, 1, 1], [], []>} : vector<4x4xbf16>, vector<4x128xbf16>, vector<4x128xf32> -> vector<4x128xf32>
    %21 = arith.addf %15, %20 : vector<4x128xf32>
    %cst_29 = arith.constant 0.000000e+00 : f32
    %22 = vector.broadcast %cst_29 : f32 to vector<4x128xf32>
    %23 = arith.cmpf oge, %21, %22 : vector<4x128xf32>
    %cst_30 = arith.constant 1.000000e-01 : f32
    %24 = vector.broadcast %cst_30 : f32 to vector<4x128xf32>
    %25 = arith.mulf %24, %21 : vector<4x128xf32>
    %26 = arith.select %23, %21, %25 : vector<4x128xi1>, vector<4x128xf32>
    %c0_31 = arith.constant 0 : index
    %c0_32 = arith.constant 0 : index
    %c0_33 = arith.constant 0 : index
    %c0_34 = arith.constant 0 : index
    %27 = vector.load %arg6[%c0_31, %c0_32, %c0_33, %c0_34] : memref<1x1x4x128xf32, #tpu.memory_space<vmem>>, vector<1x1x4x128xf32>
    %28 = vector.shape_cast %27 : vector<1x1x4x128xf32> to vector<4x128xf32>
    %29 = vector.shape_cast %26 : vector<4x128xf32> to vector<1x1x4x128xf32>
    tpu.vector_store %arg6[%c0_31, %c0_32, %c0_33, %c0_34], %29 {strides = array<i32>} : memref<1x1x4x128xf32, #tpu.memory_space<vmem>>, vector<1x1x4x128xf32>,
    return
  }
  func.func @transform_0(%arg0: i32, %arg1: i32, %arg2: i32) -> (i32, i32, i32, i32, i32) {
    %c0_i32 = arith.constant 0 : i32
    %c0_i32_0 = arith.constant 0 : i32
    %c0_i32_1 = arith.constant 0 : i32
    return %arg1, %arg0, %arg2, %c0_i32, %c0_i32_0 : i32, i32, i32, i32, i32
  }
  func.func @transform_1(%arg0: i32, %arg1: i32, %arg2: i32) -> (i32, i32, i32, i32) {
    %c0_i32 = arith.constant 0 : i32
    %c0_i32_0 = arith.constant 0 : i32
    %c0_i32_1 = arith.constant 0 : i32
    %c0_i32_2 = arith.constant 0 : i32
    return %arg0, %c0_i32, %c0_i32_0, %c0_i32_1 : i32, i32, i32, i32
  }
  func.func @transform_2(%arg0: i32, %arg1: i32, %arg2: i32) -> (i32, i32, i32) {
    %c0_i32 = arith.constant 0 : i32
    %c0_i32_0 = arith.constant 0 : i32
    %c0_i32_1 = arith.constant 0 : i32
    return %arg0, %c0_i32, %c0_i32_0 : i32, i32, i32
  }
  func.func @transform_3(%arg0: i32, %arg1: i32, %arg2: i32) -> (i32, i32, i32, i32) {
    %c0_i32 = arith.constant 0 : i32
    %c0_i32_0 = arith.constant 0 : i32
    return %arg1, %arg0, %c0_i32, %arg2 : i32, i32, i32, i32
  }
}

module attributes {stable_mosaic.version = 11 : i64} {
  func.func @_gconv_kernel(%arg0: i32, %arg1: i32, %arg2: i32, %arg3: memref<1x1x1x4x132xbf16, #tpu.memory_space<vmem>>, %arg4: memref<1x5x4x4xbf16, #tpu.memory_space<vmem>>, %arg5: memref<1x4x1xf32, #tpu.memory_space<vmem>>, %arg6: memref<1x1x4x128xf32, #tpu.memory_space<vmem>>) attributes {dimension_semantics = [#tpu.dimension_semantics<parallel>, #tpu.dimension_semantics<parallel>, #tpu.dimension_semantics<parallel>], iteration_bounds = array<i64: 2, 4, 1>, scalar_prefetch = 0 : i64, scratch_operands = 0 : i64, tpu.core_type = #tpu.core_type<tc>, window_params = [{transform_indices = @transform_0, window_bounds = array<i64: 1, 1, 1, 4, 132>}, {transform_indices = @transform_1, window_bounds = array<i64: 1, 5, 4, 4>}, {transform_indices = @transform_2, window_bounds = array<i64: 1, 4, 1>}, {transform_indices = @transform_3, window_bounds = array<i64: 1, 1, 4, 128>}]} {
    %c0 = arith.constant 0 : index
    %c0_0 = arith.constant 0 : index
    %c0_1 = arith.constant 0 : index
    %0 = vector.load %arg5[%c0, %c0_0, %c0_1] : memref<1x4x1xf32, #tpu.memory_space<vmem>>, vector<1x4x1xf32>
    %1 = vector.shape_cast %0 : vector<1x4x1xf32> to vector<4x1xf32>
    %2 = vector.shape_cast %1 : vector<4x1xf32> to vector<4x1xf32>
    %3 = vector.broadcast %2 : vector<4x1xf32> to vector<4x128xf32>
    %c0_2 = arith.constant 0 : index
    %c0_3 = arith.constant 0 : index
    %c0_4 = arith.constant 0 : index
    %c0_5 = arith.constant 0 : index
    %4 = vector.load %arg4[%c0_2, %c0_3, %c0_4, %c0_5] : memref<1x5x4x4xbf16, #tpu.memory_space<vmem>>, vector<1x1x4x4xbf16>
    %5 = vector.shape_cast %4 : vector<1x1x4x4xbf16> to vector<4x4xbf16>
    %c0_6 = arith.constant 0 : index
    %c0_7 = arith.constant 0 : index
    %c0_8 = arith.constant 0 : index
    %c0_9 = arith.constant 0 : index
    %c0_10 = arith.constant 0 : index
    %6 = vector.load %arg3[%c0_6, %c0_7, %c0_8, %c0_9, %c0_10] : memref<1x1x1x4x132xbf16, #tpu.memory_space<vmem>>, vector<1x1x1x4x128xbf16>
    %7 = vector.shape_cast %6 : vector<1x1x1x4x128xbf16> to vector<4x128xbf16>
    %cst = arith.constant dense<0.000000e+00> : vector<4x128xf32>
    %8 = tpu.matmul %5, %7, %cst {dimension_numbers = #tpu.dot_dimension_numbers<[1], [0], [0], [1], [0, 0, 1, 1], [], []>} : vector<4x4xbf16>, vector<4x128xbf16>, vector<4x128xf32> -> vector<4x128xf32>
    %9 = arith.addf %3, %8 : vector<4x128xf32>
    %c0_11 = arith.constant 0 : index
    %c1 = arith.constant 1 : index
    %c0_12 = arith.constant 0 : index
    %c0_13 = arith.constant 0 : index
    %10 = vector.load %arg4[%c0_11, %c1, %c0_12, %c0_13] : memref<1x5x4x4xbf16, #tpu.memory_space<vmem>>, vector<1x1x4x4xbf16>
    %11 = vector.shape_cast %10 : vector<1x1x4x4xbf16> to vector<4x4xbf16>
    %c0_14 = arith.constant 0 : index
    %c0_15 = arith.constant 0 : index
    %c0_16 = arith.constant 0 : index
    %c0_17 = arith.constant 0 : index
    %c1_18 = arith.constant 1 : index
    %12 = vector.load %arg3[%c0_14, %c0_15, %c0_16, %c0_17, %c1_18] : memref<1x1x1x4x132xbf16, #tpu.memory_space<vmem>>, vector<1x1x1x4x128xbf16>
    %13 = vector.shape_cast %12 : vector<1x1x1x4x128xbf16> to vector<4x128xbf16>
    %cst_19 = arith.constant dense<0.000000e+00> : vector<4x128xf32>
    %14 = tpu.matmul %11, %13, %cst_19 {dimension_numbers = #tpu.dot_dimension_numbers<[1], [0], [0], [1], [0, 0, 1, 1], [], []>} : vector<4x4xbf16>, vector<4x128xbf16>, vector<4x128xf32> -> vector<4x128xf32>
    %15 = arith.addf %9, %14 : vector<4x128xf32>
    %c0_20 = arith.constant 0 : index
    %c2 = arith.constant 2 : index
    %c0_21 = arith.constant 0 : index
    %c0_22 = arith.constant 0 : index
    %16 = vector.load %arg4[%c0_20, %c2, %c0_21, %c0_22] : memref<1x5x4x4xbf16, #tpu.memory_space<vmem>>, vector<1x1x4x4xbf16>
    %17 = vector.shape_cast %16 : vector<1x1x4x4xbf16> to vector<4x4xbf16>
    %c0_23 = arith.constant 0 : index
    %c0_24 = arith.constant 0 : index
    %c0_25 = arith.constant 0 : index
    %c0_26 = arith.constant 0 : index
    %c2_27 = arith.constant 2 : index
    %18 = vector.load %arg3[%c0_23, %c0_24, %c0_25, %c0_26, %c2_27] : memref<1x1x1x4x132xbf16, #tpu.memory_space<vmem>>, vector<1x1x1x4x128xbf16>
    %19 = vector.shape_cast %18 : vector<1x1x1x4x128xbf16> to vector<4x128xbf16>
    %cst_28 = arith.constant dense<0.000000e+00> : vector<4x128xf32>
    %20 = tpu.matmul %17, %19, %cst_28 {dimension_numbers = #tpu.dot_dimension_numbers<[1], [0], [0], [1], [0, 0, 1, 1], [], []>} : vector<4x4xbf16>, vector<4x128xbf16>, vector<4x128xf32> -> vector<4x128xf32>
    %21 = arith.addf %15, %20 : vector<4x128xf32>
    %c0_29 = arith.constant 0 : index
    %c3 = arith.constant 3 : index
    %c0_30 = arith.constant 0 : index
    %c0_31 = arith.constant 0 : index
    %22 = vector.load %arg4[%c0_29, %c3, %c0_30, %c0_31] : memref<1x5x4x4xbf16, #tpu.memory_space<vmem>>, vector<1x1x4x4xbf16>
    %23 = vector.shape_cast %22 : vector<1x1x4x4xbf16> to vector<4x4xbf16>
    %c0_32 = arith.constant 0 : index
    %c0_33 = arith.constant 0 : index
    %c0_34 = arith.constant 0 : index
    %c0_35 = arith.constant 0 : index
    %c3_36 = arith.constant 3 : index
    %24 = vector.load %arg3[%c0_32, %c0_33, %c0_34, %c0_35, %c3_36] : memref<1x1x1x4x132xbf16, #tpu.memory_space<vmem>>, vector<1x1x1x4x128xbf16>
    %25 = vector.shape_cast %24 : vector<1x1x1x4x128xbf16> to vector<4x128xbf16>
    %cst_37 = arith.constant dense<0.000000e+00> : vector<4x128xf32>
    %26 = tpu.matmul %23, %25, %cst_37 {dimension_numbers = #tpu.dot_dimension_numbers<[1], [0], [0], [1], [0, 0, 1, 1], [], []>} : vector<4x4xbf16>, vector<4x128xbf16>, vector<4x128xf32> -> vector<4x128xf32>
    %27 = arith.addf %21, %26 : vector<4x128xf32>
    %c0_38 = arith.constant 0 : index
    %c4 = arith.constant 4 : index
    %c0_39 = arith.constant 0 : index
    %c0_40 = arith.constant 0 : index
    %28 = vector.load %arg4[%c0_38, %c4, %c0_39, %c0_40] : memref<1x5x4x4xbf16, #tpu.memory_space<vmem>>, vector<1x1x4x4xbf16>
    %29 = vector.shape_cast %28 : vector<1x1x4x4xbf16> to vector<4x4xbf16>
    %c0_41 = arith.constant 0 : index
    %c0_42 = arith.constant 0 : index
    %c0_43 = arith.constant 0 : index
    %c0_44 = arith.constant 0 : index
    %c4_45 = arith.constant 4 : index
    %30 = vector.load %arg3[%c0_41, %c0_42, %c0_43, %c0_44, %c4_45] : memref<1x1x1x4x132xbf16, #tpu.memory_space<vmem>>, vector<1x1x1x4x128xbf16>
    %31 = vector.shape_cast %30 : vector<1x1x1x4x128xbf16> to vector<4x128xbf16>
    %cst_46 = arith.constant dense<0.000000e+00> : vector<4x128xf32>
    %32 = tpu.matmul %29, %31, %cst_46 {dimension_numbers = #tpu.dot_dimension_numbers<[1], [0], [0], [1], [0, 0, 1, 1], [], []>} : vector<4x4xbf16>, vector<4x128xbf16>, vector<4x128xf32> -> vector<4x128xf32>
    %33 = arith.addf %27, %32 : vector<4x128xf32>
    %cst_47 = arith.constant 0.000000e+00 : f32
    %34 = vector.broadcast %cst_47 : f32 to vector<4x128xf32>
    %35 = arith.cmpf oge, %33, %34 : vector<4x128xf32>
    %cst_48 = arith.constant 1.000000e-01 : f32
    %36 = vector.broadcast %cst_48 : f32 to vector<4x128xf32>
    %37 = arith.mulf %36, %33 : vector<4x128xf32>
    %38 = arith.select %35, %33, %37 : vector<4x128xi1>, vector<4x128xf32>
    %c0_49 = arith.constant 0 : index
    %c0_50 = arith.constant 0 : index
    %c0_51 = arith.constant 0 : index
    %c0_52 = arith.constant 0 : index
    %39 = vector.load %arg6[%c0_49, %c0_50, %c0_51, %c0_52] : memref<1x1x4x128xf32, #tpu.memory_space<vmem>>, vector<1x1x4x128xf32>
    %40 = vector.shape_cast %39 : vector<1x1x4x128xf32> to vector<4x128xf32>
    %41 = vector.shape_cast %38 : vector<4x128xf32> to vector<1x1x4x128xf32>
    tpu.vector_store %arg6[%c0_49, %c0_50, %c0_51, %c0_52], %41 {strides = array<i32>} : memref<1x1x4x128xf32, #tpu.memory_space<vmem>>, vector<1x1x4x128xf32>,
    return
  }
  func.func @transform_0(%arg0: i32, %arg1: i32, %arg2: i32) -> (i32, i32, i32, i32, i32) {
    %c0_i32 = arith.constant 0 : i32
    %c0_i32_0 = arith.constant 0 : i32
    %c0_i32_1 = arith.constant 0 : i32
    return %arg1, %arg0, %arg2, %c0_i32, %c0_i32_0 : i32, i32, i32, i32, i32
  }
  func.func @transform_1(%arg0: i32, %arg1: i32, %arg2: i32) -> (i32, i32, i32, i32) {
    %c0_i32 = arith.constant 0 : i32
    %c0_i32_0 = arith.constant 0 : i32
    %c0_i32_1 = arith.constant 0 : i32
    %c0_i32_2 = arith.constant 0 : i32
    return %arg0, %c0_i32, %c0_i32_0, %c0_i32_1 : i32, i32, i32, i32
  }
  func.func @transform_2(%arg0: i32, %arg1: i32, %arg2: i32) -> (i32, i32, i32) {
    %c0_i32 = arith.constant 0 : i32
    %c0_i32_0 = arith.constant 0 : i32
    %c0_i32_1 = arith.constant 0 : i32
    return %arg0, %c0_i32, %c0_i32_0 : i32, i32, i32
  }
  func.func @transform_3(%arg0: i32, %arg1: i32, %arg2: i32) -> (i32, i32, i32, i32) {
    %c0_i32 = arith.constant 0 : i32
    %c0_i32_0 = arith.constant 0 : i32
    return %arg1, %arg0, %c0_i32, %arg2 : i32, i32, i32, i32
  }
}

module attributes {stable_mosaic.version = 11 : i64} {
  func.func @_gconv_kernel(%arg0: i32, %arg1: i32, %arg2: i32, %arg3: memref<1x1x1x8x130xbf16, #tpu.memory_space<vmem>>, %arg4: memref<1x3x1x8xbf16, #tpu.memory_space<vmem>>, %arg5: memref<1x1x1xf32, #tpu.memory_space<vmem>>, %arg6: memref<1x1x1x128xf32, #tpu.memory_space<vmem>>) attributes {dimension_semantics = [#tpu.dimension_semantics<parallel>, #tpu.dimension_semantics<parallel>, #tpu.dimension_semantics<parallel>], iteration_bounds = array<i64: 1, 4, 1>, scalar_prefetch = 0 : i64, scratch_operands = 0 : i64, tpu.core_type = #tpu.core_type<tc>, window_params = [{transform_indices = @transform_0, window_bounds = array<i64: 1, 1, 1, 8, 130>}, {transform_indices = @transform_1, window_bounds = array<i64: 1, 3, 1, 8>}, {transform_indices = @transform_2, window_bounds = array<i64: 1, 1, 1>}, {transform_indices = @transform_3, window_bounds = array<i64: 1, 1, 1, 128>}]} {
    %c0 = arith.constant 0 : index
    %c0_0 = arith.constant 0 : index
    %c0_1 = arith.constant 0 : index
    %0 = vector.load %arg5[%c0, %c0_0, %c0_1] : memref<1x1x1xf32, #tpu.memory_space<vmem>>, vector<1x1x1xf32>
    %1 = vector.shape_cast %0 : vector<1x1x1xf32> to vector<1x1xf32>
    %2 = vector.shape_cast %1 : vector<1x1xf32> to vector<1x1xf32>
    %3 = vector.broadcast %2 : vector<1x1xf32> to vector<1x128xf32>
    %c0_2 = arith.constant 0 : index
    %c0_3 = arith.constant 0 : index
    %c0_4 = arith.constant 0 : index
    %c0_5 = arith.constant 0 : index
    %4 = vector.load %arg4[%c0_2, %c0_3, %c0_4, %c0_5] : memref<1x3x1x8xbf16, #tpu.memory_space<vmem>>, vector<1x1x1x8xbf16>
    %5 = vector.shape_cast %4 : vector<1x1x1x8xbf16> to vector<1x8xbf16>
    %c0_6 = arith.constant 0 : index
    %c0_7 = arith.constant 0 : index
    %c0_8 = arith.constant 0 : index
    %c0_9 = arith.constant 0 : index
    %c0_10 = arith.constant 0 : index
    %6 = vector.load %arg3[%c0_6, %c0_7, %c0_8, %c0_9, %c0_10] : memref<1x1x1x8x130xbf16, #tpu.memory_space<vmem>>, vector<1x1x1x8x128xbf16>
    %7 = vector.shape_cast %6 : vector<1x1x1x8x128xbf16> to vector<8x128xbf16>
    %cst = arith.constant dense<0.000000e+00> : vector<1x128xf32>
    %8 = tpu.matmul %5, %7, %cst {dimension_numbers = #tpu.dot_dimension_numbers<[1], [0], [0], [1], [0, 0, 1, 1], [], []>} : vector<1x8xbf16>, vector<8x128xbf16>, vector<1x128xf32> -> vector<1x128xf32>
    %9 = arith.addf %3, %8 : vector<1x128xf32>
    %c0_11 = arith.constant 0 : index
    %c1 = arith.constant 1 : index
    %c0_12 = arith.constant 0 : index
    %c0_13 = arith.constant 0 : index
    %10 = vector.load %arg4[%c0_11, %c1, %c0_12, %c0_13] : memref<1x3x1x8xbf16, #tpu.memory_space<vmem>>, vector<1x1x1x8xbf16>
    %11 = vector.shape_cast %10 : vector<1x1x1x8xbf16> to vector<1x8xbf16>
    %c0_14 = arith.constant 0 : index
    %c0_15 = arith.constant 0 : index
    %c0_16 = arith.constant 0 : index
    %c0_17 = arith.constant 0 : index
    %c1_18 = arith.constant 1 : index
    %12 = vector.load %arg3[%c0_14, %c0_15, %c0_16, %c0_17, %c1_18] : memref<1x1x1x8x130xbf16, #tpu.memory_space<vmem>>, vector<1x1x1x8x128xbf16>
    %13 = vector.shape_cast %12 : vector<1x1x1x8x128xbf16> to vector<8x128xbf16>
    %cst_19 = arith.constant dense<0.000000e+00> : vector<1x128xf32>
    %14 = tpu.matmul %11, %13, %cst_19 {dimension_numbers = #tpu.dot_dimension_numbers<[1], [0], [0], [1], [0, 0, 1, 1], [], []>} : vector<1x8xbf16>, vector<8x128xbf16>, vector<1x128xf32> -> vector<1x128xf32>
    %15 = arith.addf %9, %14 : vector<1x128xf32>
    %c0_20 = arith.constant 0 : index
    %c2 = arith.constant 2 : index
    %c0_21 = arith.constant 0 : index
    %c0_22 = arith.constant 0 : index
    %16 = vector.load %arg4[%c0_20, %c2, %c0_21, %c0_22] : memref<1x3x1x8xbf16, #tpu.memory_space<vmem>>, vector<1x1x1x8xbf16>
    %17 = vector.shape_cast %16 : vector<1x1x1x8xbf16> to vector<1x8xbf16>
    %c0_23 = arith.constant 0 : index
    %c0_24 = arith.constant 0 : index
    %c0_25 = arith.constant 0 : index
    %c0_26 = arith.constant 0 : index
    %c2_27 = arith.constant 2 : index
    %18 = vector.load %arg3[%c0_23, %c0_24, %c0_25, %c0_26, %c2_27] : memref<1x1x1x8x130xbf16, #tpu.memory_space<vmem>>, vector<1x1x1x8x128xbf16>
    %19 = vector.shape_cast %18 : vector<1x1x1x8x128xbf16> to vector<8x128xbf16>
    %cst_28 = arith.constant dense<0.000000e+00> : vector<1x128xf32>
    %20 = tpu.matmul %17, %19, %cst_28 {dimension_numbers = #tpu.dot_dimension_numbers<[1], [0], [0], [1], [0, 0, 1, 1], [], []>} : vector<1x8xbf16>, vector<8x128xbf16>, vector<1x128xf32> -> vector<1x128xf32>
    %21 = arith.addf %15, %20 : vector<1x128xf32>
    %c0_29 = arith.constant 0 : index
    %c0_30 = arith.constant 0 : index
    %c0_31 = arith.constant 0 : index
    %c0_32 = arith.constant 0 : index
    %22 = vector.load %arg6[%c0_29, %c0_30, %c0_31, %c0_32] : memref<1x1x1x128xf32, #tpu.memory_space<vmem>>, vector<1x1x1x128xf32>
    %23 = vector.shape_cast %22 : vector<1x1x1x128xf32> to vector<1x128xf32>
    %24 = vector.shape_cast %21 : vector<1x128xf32> to vector<1x1x1x128xf32>
    tpu.vector_store %arg6[%c0_29, %c0_30, %c0_31, %c0_32], %24 {strides = array<i32>} : memref<1x1x1x128xf32, #tpu.memory_space<vmem>>, vector<1x1x1x128xf32>,
    return
  }
  func.func @transform_0(%arg0: i32, %arg1: i32, %arg2: i32) -> (i32, i32, i32, i32, i32) {
    %c0_i32 = arith.constant 0 : i32
    %c0_i32_0 = arith.constant 0 : i32
    %c0_i32_1 = arith.constant 0 : i32
    return %arg1, %arg0, %arg2, %c0_i32, %c0_i32_0 : i32, i32, i32, i32, i32
  }
  func.func @transform_1(%arg0: i32, %arg1: i32, %arg2: i32) -> (i32, i32, i32, i32) {
    %c0_i32 = arith.constant 0 : i32
    %c0_i32_0 = arith.constant 0 : i32
    %c0_i32_1 = arith.constant 0 : i32
    %c0_i32_2 = arith.constant 0 : i32
    return %arg0, %c0_i32, %c0_i32_0, %c0_i32_1 : i32, i32, i32, i32
  }
  func.func @transform_2(%arg0: i32, %arg1: i32, %arg2: i32) -> (i32, i32, i32) {
    %c0_i32 = arith.constant 0 : i32
    %c0_i32_0 = arith.constant 0 : i32
    %c0_i32_1 = arith.constant 0 : i32
    return %arg0, %c0_i32, %c0_i32_0 : i32, i32, i32
  }
  func.func @transform_3(%arg0: i32, %arg1: i32, %arg2: i32) -> (i32, i32, i32, i32) {
    %c0_i32 = arith.constant 0 : i32
    %c0_i32_0 = arith.constant 0 : i32
    return %arg1, %arg0, %c0_i32, %arg2 : i32, i32, i32, i32
  }
}

module attributes {stable_mosaic.version = 11 : i64} {
  func.func @_avgpool_kernel(%arg0: i32, %arg1: i32, %arg2: memref<1x1x1x2x129xf32, #tpu.memory_space<vmem>>, %arg3: memref<1x1x128xf32, #tpu.memory_space<vmem>>) attributes {dimension_semantics = [#tpu.dimension_semantics<parallel>, #tpu.dimension_semantics<parallel>], iteration_bounds = array<i64: 4, 1>, scalar_prefetch = 0 : i64, scratch_operands = 0 : i64, tpu.core_type = #tpu.core_type<tc>, window_params = [{transform_indices = @transform_0, window_bounds = array<i64: 1, 1, 1, 2, 129>}, {transform_indices = @transform_1, window_bounds = array<i64: 1, 1, 128>}]} {
    %c0 = arith.constant 0 : index
    %c0_0 = arith.constant 0 : index
    %c0_1 = arith.constant 0 : index
    %c0_2 = arith.constant 0 : index
    %c0_3 = arith.constant 0 : index
    %0 = vector.load %arg2[%c0, %c0_0, %c0_1, %c0_2, %c0_3] : memref<1x1x1x2x129xf32, #tpu.memory_space<vmem>>, vector<1x1x1x2x129xf32>
    %1 = vector.shape_cast %0 : vector<1x1x1x2x129xf32> to vector<1x2x129xf32>
    %2 = vector.extract_strided_slice %1 {offsets = [0, 0, 0], sizes = [1, 1, 128], strides = [1, 1, 1]} : vector<1x2x129xf32> to vector<1x1x128xf32>
    %3 = vector.shape_cast %2 : vector<1x1x128xf32> to vector<1x128xf32>
    %4 = vector.extract_strided_slice %1 {offsets = [0, 1, 0], sizes = [1, 1, 128], strides = [1, 1, 1]} : vector<1x2x129xf32> to vector<1x1x128xf32>
    %5 = vector.shape_cast %4 : vector<1x1x128xf32> to vector<1x128xf32>
    %6 = arith.addf %3, %5 : vector<1x128xf32>
    %7 = vector.extract_strided_slice %1 {offsets = [0, 0, 1], sizes = [1, 1, 128], strides = [1, 1, 1]} : vector<1x2x129xf32> to vector<1x1x128xf32>
    %8 = vector.shape_cast %7 : vector<1x1x128xf32> to vector<1x128xf32>
    %9 = arith.addf %6, %8 : vector<1x128xf32>
    %10 = vector.extract_strided_slice %1 {offsets = [0, 1, 1], sizes = [1, 1, 128], strides = [1, 1, 1]} : vector<1x2x129xf32> to vector<1x1x128xf32>
    %11 = vector.shape_cast %10 : vector<1x1x128xf32> to vector<1x128xf32>
    %12 = arith.addf %9, %11 : vector<1x128xf32>
    %cst = arith.constant 2.500000e-01 : f32
    %13 = vector.broadcast %cst : f32 to vector<1x128xf32>
    %14 = arith.mulf %13, %12 : vector<1x128xf32>
    %c0_4 = arith.constant 0 : index
    %c0_5 = arith.constant 0 : index
    %c0_6 = arith.constant 0 : index
    %15 = vector.load %arg3[%c0_4, %c0_5, %c0_6] : memref<1x1x128xf32, #tpu.memory_space<vmem>>, vector<1x1x128xf32>
    %16 = vector.shape_cast %15 : vector<1x1x128xf32> to vector<1x128xf32>
    %17 = vector.shape_cast %14 : vector<1x128xf32> to vector<1x1x128xf32>
    tpu.vector_store %arg3[%c0_4, %c0_5, %c0_6], %17 {strides = array<i32>} : memref<1x1x128xf32, #tpu.memory_space<vmem>>, vector<1x1x128xf32>,
    return
  }
  func.func @transform_0(%arg0: i32, %arg1: i32) -> (i32, i32, i32, i32, i32) {
    %c0_i32 = arith.constant 0 : i32
    %c0_i32_0 = arith.constant 0 : i32
    %c0_i32_1 = arith.constant 0 : i32
    %c0_i32_2 = arith.constant 0 : i32
    return %arg0, %c0_i32, %arg1, %c0_i32_0, %c0_i32_1 : i32, i32, i32, i32, i32
  }
  func.func @transform_1(%arg0: i32, %arg1: i32) -> (i32, i32, i32) {
    %c0_i32 = arith.constant 0 : i32
    %c0_i32_0 = arith.constant 0 : i32
    return %arg0, %c0_i32, %arg1 : i32, i32, i32
  }
}

</mosaic_0001>

<bundles_post_ra>
// kernel: msd_forward.14
= control target key start
LH: loop header
LB: loop body
LE: loop exit
PB: predicated region body
PF: predicated region fallthrough
CT: control target
= control target key end

     0   :  { %s742_s12 = smov 0   ;;  %s744_s13 = smov 0   ;;  %s800_s0 = inlined_call_operand.vmem [shape: bf16[4,1,1,2,130], index: 0, kind: input, shape index: {}]   ;;  %s801_s1 = inlined_call_operand.vmem [shape: bf16[1,3,4,2], index: 1, kind: input, shape index: {}]   ;;  %s802_s2 = inlined_call_operand.vmem [shape: f32[1,4,1], index: 2, kind: input, shape index: {}]   ;;  %s803_s3 = inlined_call_operand.vmem [shape: f32[4,1,4,128], index: 3, kind: output, shape index: {}]  }
   0x1   :  { %s746_s14 = smov 0  }
   0x2 LB: > { %s28_s15 = sadd.s32 1, %s710_s13  ;;  %p619_p0 = scmp.ge.s32.totalorder %s714_s14, 1  ;;  %s714_s14 = sphi %s746_s14, %s13_s14   ;;  %s710_s13 = sphi %s744_s13, %s805_s13   ;;  %s706_s12 = sphi %s742_s12, %s804_s12  }
   0x3   : > { %p30_p1 = scmp.ge.s32.totalorder %s28_s15, 4  ;;  %p190_p2 = scmp.lt.s32.totalorder %s714_s14, 5 }
   0x5   : > { %s807_s15 = smov (%p30_p1, %s28_s15), 0  ;;  %p191_p3 = pnand %p619_p0, %p190_p2 }
   0x6   : > { %p235_p4 = scmp.lt.s32.totalorder (!%p191_p3), %s706_s12, 3  ;;  %v339_v0 = vlaneseq (!%p191_p3)  ;;  %v716_v1 = vmov (!%p191_p3), 1966171168   ;;  %v717_v4 = vmov (!%p191_p3), 0.0   ;;  %vm718_vm0 = vmmov (!%p191_p3), 0   ;;  %s719_s22 = smov (!%p191_p3), 126  }
   0x7   : > { %194 = sbr.rel (%p191_p3) target bundleno = 375 (0x177), region = 32  ;;  %v337_v2 = vunpack.c.l.s4 (!%p191_p3), %v716_v1  ;;  %643 = vmatprep.subr.bf16.mxu0 (!%p191_p3), %v717_v4  ;;  %637 = vmatprep.subr.bf16.mxu1 (!%p191_p3), %v717_v4  ;;  %vm279_vm1 = vcmask (!%p191_p3), 1040384   ;;  %v273_v12 = vld [vmem:[%s801_s1] sm:$0x3] (!%p191_p3)  ;;  %s720_s23 = smov (!%p191_p3), 127   ;;  %vm275_vm2 = vcmask (!%p191_p3), 15360  }
   0x8   : > { %v340_v3 = vshrl.u32 (!%p191_p3), %v339_v0, 7  ;;  %645 = vmatprep.mubr.msk.bf16.mxu0 (!%p191_p3), %vm718_vm0, %v717_v4  ;;  %639 = vmatprep.mubr.msk.bf16.mxu1 (!%p191_p3), %vm718_vm0, %v717_v4  ;;  %v267_v14 = vld [vmem:[%s802_s2] sm:$0xf] (!%p191_p3)  ;;  %v721_v15 = vmov (!%p191_p3), 0   ;;  %vm433_vm3 = vcmask (!%p191_p3), 1031168   ;;  %vm354_vm4 = vcmask (!%p191_p3), 1039360  }
   0x9   : > { %v338_v5 = vunpack.c.0.s8 (!%p191_p3), %v337_v2  ;;  %691 = vset.pattern.permute.xlu0 (!%p191_p3), %v721_v15  ;;  %v623_v23 = vld [vmem:[%s801_s1 + $0x2] sm:$0x3] (!%p191_p3)  ;;  %v626_v25 = vld [vmem:[%s801_s1 + $0x4] sm:$0x3] (!%p191_p3) }
   0xb   : > { %v341_v6 = vsub.s32 (!%p191_p3), %v338_v5, %v340_v3 }
   0xe   : > { %s809_s12 = smov (!%p235_p4, %s706_s12), 3 }
   0xf   : > { %s620_s16 = sshll.u32 %s809_s12, 1  ;;  %s621_s30 = sshll.u32 %s809_s12, 2 }
  0x10   : > { %s246_s19 = scalar_lea.vmem %s800_s0, %s620_s16  ;;  %s265_s6 = scalar_lea.vmem %s803_s3, %s621_s30 }
  0x11   : > { %v627_v7 = vld.sshfl [vmem:[%s246_s19] sm:$0x11 pattern:$0x75316420] }
  0x12   : > { %v274_v8 = vld [vmem:[%s246_s19] sm:$0x1]  ;;  %v421_v9 = vrot.slane %v627_v7, %v341_v6  ;;  %v414_v10 = vcombine.high %v627_v7, %v627_v7 }
  0x13   : > { %v281_v11 = vsel %vm279_vm1, %v274_v8, 0 }
  0x14   : > { %638 = vmatpush3.bf16.msra.mxu1 %v281_v11  ;;  %429 = vrot.lane.b32.xlu1 %v421_v9, %s719_s22  ;;  %v428_v13 = vrot.slane %v414_v10, %v341_v6 }
  0x15   : > { %350 = vrot.lane.b32.xlu0 %v421_v9, %s720_s23 }
  0x17   : > { %640 = vmatmul.mubr.msk.bf16.vlgmr.msra.gmra.mrb[0].mxu1 %vm275_vm2, %v273_v12 }
  0x18   : > { %431 = vrot.lane.b32.xlu1 %v428_v13, %s719_s22 }
  0x19   : > { %352 = vrot.lane.b32.xlu0 %v428_v13, %s720_s23 }
  0x1d   : > { %270 = vperm.xlu0 %691, %v267_v14  }
  0x86   : > { %v430_v16 = vpop.permute.xlu1 %429 }
  0x87   : > { %v351_v17 = vpop.permute.xlu0 %350 }
  0x8a   : > { %v432_v18 = vpop.permute.xlu1 %431 }
  0x8b   : > { %v353_v19 = vpop.permute.xlu0 %352  ;;  %v434_v20 = vsel %vm433_vm3, %v430_v16, %v432_v18 }
  0x8c   : > { %v355_v21 = vsel %vm354_vm4, %v351_v17, %v353_v19  ;;  %v439_v24 = vsel %vm279_vm1, %v434_v20, 0 }
  0x8d   : > { %v360_v22 = vsel %vm279_vm1, %v355_v21, 0 }
  0x8e   : > { %644 = vmatpush3.bf16.msra.mxu0 %v360_v22 }
  0x8f   : > { %649 = vmatprep.subr.bf16.mxu0 %v717_v4 }
  0x91   : > { %646 = vmatmul.mubr.msk.bf16.vlgmr.msra.gmra.mrb[0].mxu0 %vm275_vm2, %v623_v23 }
  0x92   : > { %650 = vmatpush3.bf16.msra.mxu0 %v439_v24  ;;  %651 = vmatprep.mubr.msk.bf16.mxu0 %vm718_vm0, %v717_v4 }
  0x9c   : > { %v271_v30 = vpop.permute.xlu0 %270 }
  0x9d   : > { %652 = vmatmul.mubr.msk.bf16.vlgmr.msra.gmra.mrb[0].mxu0 %vm275_vm2, %v626_v25 }
  0xea   : > { %v317_v26 = vpop.f32.mrb[0].mxu1 }
  0xeb   : > { %v641_v27 = vpop.f32.mrb[1].mxu1  ;;  %v323_v31 = vadd.f32 %v317_v26, %v271_v30 }
  0xec   : > { %v320_v28 = vpop.f32.mrb[2].mxu1 }
  0xed   : > { %v642_v29 = vpop.f32.mrb[3].mxu1 }
 0x170   : > { %v475_v32 = vpop.f32.mrb[0].mxu0 }
 0x171   : > { %v656_v33 = vadd.f32 %v475_v32, %v323_v31  ;;  %v653_v34 = vpop.f32.mrb[1].mxu0 }
 0x172   : > { %v478_v35 = vpop.f32.mrb[2].mxu0 }
 0x173   : > { %vm482_vm5 = vcmp.ge.f32.partialorder %v656_v33, 0.0  ;;  %v483_v36 = vmul.f32 0.1, %v656_v33  ;;  %v654_v37 = vpop.f32.mrb[3].mxu0 }
 0x175   : > { %v484_v38 = vsel %vm482_vm5, %v656_v33, %v483_v36 }
 0x176   : > { %485 = vst [vmem:[%s265_s6] sm:$0xf] %v484_v38 }
 0x177 PF: > { %s13_s14 = sadd.s32 1, %s714_s14   ;;  %s804_s12 = smov %s710_s13 }
 0x178   : > { %p10_p5 = scmp.ge.s32.totalorder %s13_s14, 6   ;;  %s805_s13 = smov %s807_s15 }
 0x17a   :  { %12 = sbr.rel (!%p10_p5) target bundleno = 2 (0x2), region = 70 }

// kernel: msd_forward.15
= control target key start
LH: loop header
LB: loop body
LE: loop exit
PB: predicated region body
PF: predicated region fallthrough
CT: control target
= control target key end

     0   :  { %s758_s12 = smov 0   ;;  %s760_s13 = smov 0   ;;  %s834_s0 = inlined_call_operand.vmem [shape: bf16[4,2,1,4,130], index: 0, kind: input, shape index: {}]   ;;  %s835_s1 = inlined_call_operand.vmem [shape: bf16[2,3,4,4], index: 1, kind: input, shape index: {}]   ;;  %s836_s2 = inlined_call_operand.vmem [shape: f32[2,4,1], index: 2, kind: input, shape index: {}]   ;;  %s837_s3 = inlined_call_operand.vmem [shape: f32[4,2,4,128], index: 3, kind: output, shape index: {}]  }
   0x1   :  { %s762_s14 = smov 0   ;;  %s764_s15 = smov 0  }
   0x2   :  { %s766_s16 = smov 0  }
   0x3 LB: > { %s28_s17 = sadd.s32 1, %s723_s14  ;;  %s32_s18 = sadd.s32 1, %s727_s15  ;;  %s731_s16 = sphi %s766_s16, %s13_s16   ;;  %s727_s15 = sphi %s764_s15, %s841_s15   ;;  %s723_s14 = sphi %s762_s14, %s840_s14   ;;  %s719_s13 = sphi %s760_s13, %s839_s13   ;;  %s715_s12 = sphi %s758_s12, %s838_s12  }
   0x4   : > { %p30_p0 = scmp.ge.s32.totalorder %s28_s17, 4  ;;  %p599_p1 = scmp.ge.s32.totalorder %s731_s16, 1 }
   0x5   : > { %p191_p2 = scmp.lt.s32.totalorder %s731_s16, 9 }
   0x6   : > { %s843_s17 = smov (%p30_p0, %s28_s17), 0  ;;  %s845_s18 = smov (!%p30_p0, %s32_s18), %s727_s15 }
   0x7   : > { %p192_p3 = pnand %p599_p1, %p191_p2  ;;  %p34_p4 = scmp.ge.s32.totalorder %s845_s18, 2 }
   0x8   : > { %p238_p5 = scmp.lt.s32.totalorder (!%p192_p3), %s715_s12, 3  ;;  %p240_p6 = scmp.lt.s32.totalorder (!%p192_p3), %s719_s13, 1  ;;  %v733_v0 = vmov (!%p192_p3), 0.0   ;;  %vm734_vm0 = vmmov (!%p192_p3), 0   ;;  %vm284_vm1 = vcmask (!%p192_p3), 1041408   ;;  %vm280_vm2 = vcmask (!%p192_p3), 31744  }
   0x9   : > { %s847_s18 = smov (%p34_p4, %s845_s18), 0  ;;  %195 = sbr.rel (%p192_p3) target bundleno = 376 (0x178), region = 32 }
   0xa   : > { %628 = vmatprep.subr.bf16.mxu0 (!%p192_p3), %v733_v0  ;;  %622 = vmatprep.subr.bf16.mxu1 (!%p192_p3), %v733_v0  ;;  %s735_s27 = smov (!%p192_p3), 126   ;;  %s736_s28 = smov (!%p192_p3), 127   ;;  %v737_v6 = vmov (!%p192_p3), 0   ;;  %vm410_vm3 = vcmask (!%p192_p3), 1031168   ;;  %vm345_vm4 = vcmask (!%p192_p3), 1039360  }
   0xb   : > { %630 = vmatprep.mubr.msk.bf16.mxu0 (!%p192_p3), %vm734_vm0, %v733_v0  ;;  %624 = vmatprep.mubr.msk.bf16.mxu1 (!%p192_p3), %vm734_vm0, %v733_v0 }
   0xc   : > { %692 = vset.pattern.permute.xlu0 (!%p192_p3), %v737_v6 }
  0x10   : > { %s849_s12 = smov (!%p238_p5, %s715_s12), 3  ;;  %s851_s13 = smov (!%p240_p6, %s719_s13), 1 }
  0x11   : > { %s601_s19 = sshll.u32 %s849_s12, 2  ;;  %s600_s20 = sshll.u32 %s851_s13, 1 }
  0x12   : > { %s248_s21 = sadd.s32 %s601_s19, %s600_s20  ;;  %s646_s23 = smul.u32 6, %s851_s13 }
  0x13   : > { %s602_s22 = sshll.u32 %s248_s21, 1  ;;  %s604_s5 = sshll.u32 %s851_s13, 2 }
  0x14   : > { %s250_s26 = scalar_lea.vmem %s834_s0, %s602_s22  ;;  %s255_s4 = scalar_lea.vmem %s835_s1, %s646_s23 }
  0x15   : > { %v612_v1 = vld.sshfl [vmem:[%s250_s26] sm:$0x33 pattern:$0x76325410]  ;;  %s259_s8 = scalar_lea.vmem %s836_s2, %s604_s5  ;;  %v611_v17 = vld [vmem:[%s255_s4 + $0x4] sm:$0x3] }
  0x16   : > { %v279_v2 = vld [vmem:[%s250_s26] sm:$0x3]  ;;  %406 = vrot.lane.b32.xlu1 %v612_v1, %s735_s27  ;;  %v405_v3 = vcombine.high %v612_v1, %v612_v1  ;;  %341 = vrot.lane.b32.xlu0 %v612_v1, %s736_s28  ;;  %v608_v15 = vld [vmem:[%s255_s4 + $0x2] sm:$0x3]  ;;  %s605_s9 = sshll.u32 %s849_s12, 1 }
  0x17   : > { %v286_v4 = vsel %vm284_vm1, %v279_v2, 0  ;;  %v278_v5 = vld [vmem:[%s255_s4] sm:$0x3]  ;;  %s268_s10 = sadd.s32 %s605_s9, %s851_s13 }
  0x18   : > { %623 = vmatpush3.bf16.msra.mxu1 %v286_v4  ;;  %v272_v7 = vld [vmem:[%s259_s8] sm:$0xf]  ;;  %s606_s11 = sshll.u32 %s268_s10, 2 }
  0x19   : > { %s270_s21 = scalar_lea.vmem %s837_s3, %s606_s11 }
  0x1a   : > { %408 = vrot.lane.b32.xlu1 %v405_v3, %s735_s27  ;;  %343 = vrot.lane.b32.xlu0 %v405_v3, %s736_s28 }
  0x1b   : > { %625 = vmatmul.mubr.msk.bf16.vlgmr.msra.gmra.mrb[0].mxu1 %vm280_vm2, %v278_v5 }
  0x1e   : > { %275 = vperm.xlu0 %692, %v272_v7  }
  0x88   : > { %v407_v8 = vpop.permute.xlu1 %406  ;;  %v342_v9 = vpop.permute.xlu0 %341 }
  0x8c   : > { %v409_v10 = vpop.permute.xlu1 %408  ;;  %v344_v11 = vpop.permute.xlu0 %343 }
  0x8d   : > { %v411_v12 = vsel %vm410_vm3, %v407_v8, %v409_v10  ;;  %v346_v13 = vsel %vm345_vm4, %v342_v9, %v344_v11 }
  0x8e   : > { %v351_v14 = vsel %vm284_vm1, %v346_v13, 0  ;;  %v416_v16 = vsel %vm284_vm1, %v411_v12, 0 }
  0x8f   : > { %629 = vmatpush3.bf16.msra.mxu0 %v351_v14 }
  0x90   : > { %634 = vmatprep.subr.bf16.mxu0 %v733_v0 }
  0x92   : > { %631 = vmatmul.mubr.msk.bf16.vlgmr.msra.gmra.mrb[0].mxu0 %vm280_vm2, %v608_v15 }
  0x93   : > { %635 = vmatpush3.bf16.msra.mxu0 %v416_v16  ;;  %636 = vmatprep.mubr.msk.bf16.mxu0 %vm734_vm0, %v733_v0 }
  0x9d   : > { %v276_v22 = vpop.permute.xlu0 %275 }
  0x9e   : > { %637 = vmatmul.mubr.msk.bf16.vlgmr.msra.gmra.mrb[0].mxu0 %vm280_vm2, %v611_v17 }
  0xee   : > { %v322_v18 = vpop.f32.mrb[0].mxu1 }
  0xef   : > { %v626_v19 = vpop.f32.mrb[1].mxu1  ;;  %v328_v23 = vadd.f32 %v322_v18, %v276_v22 }
  0xf0   : > { %v325_v20 = vpop.f32.mrb[2].mxu1 }
  0xf1   : > { %v627_v21 = vpop.f32.mrb[3].mxu1 }
 0x171   : > { %v452_v24 = vpop.f32.mrb[0].mxu0 }
 0x172   : > { %v641_v25 = vadd.f32 %v452_v24, %v328_v23  ;;  %v638_v26 = vpop.f32.mrb[1].mxu0 }
 0x173   : > { %v455_v27 = vpop.f32.mrb[2].mxu0 }
 0x174   : > { %vm459_vm5 = vcmp.ge.f32.partialorder %v641_v25, 0.0  ;;  %v460_v28 = vmul.f32 0.1, %v641_v25  ;;  %v639_v29 = vpop.f32.mrb[3].mxu0 }
 0x176   : > { %v461_v30 = vsel %vm459_vm5, %v641_v25, %v460_v28 }
 0x177   : > { %462 = vst [vmem:[%s270_s21] sm:$0xf] %v461_v30 }
 0x178 PF: > { %s13_s16 = sadd.s32 1, %s731_s16   ;;  %s838_s12 = smov %s723_s14 }
 0x179   : > { %p10_p7 = scmp.ge.s32.totalorder %s13_s16, 10   ;;  %s839_s13 = smov %s727_s15 }
 0x17a   : > { %s840_s14 = smov %s843_s17  ;;  %s841_s15 = smov %s847_s18 }
 0x17b   :  { %12 = sbr.rel (!%p10_p7) target bundleno = 3 (0x3), region = 70 }

// kernel: msd_forward.16
= control target key start
LH: loop header
LB: loop body
LE: loop exit
PB: predicated region body
PF: predicated region fallthrough
CT: control target
= control target key end

     0   :  { %s922_s12 = smov 0   ;;  %s924_s13 = smov 0   ;;  %s1021_s0 = inlined_call_operand.vmem [shape: bf16[4,2,1,4,132], index: 0, kind: input, shape index: {}]   ;;  %s1022_s1 = inlined_call_operand.vmem [shape: bf16[2,5,4,4], index: 1, kind: input, shape index: {}]   ;;  %s1023_s2 = inlined_call_operand.vmem [shape: f32[2,4,1], index: 2, kind: input, shape index: {}]   ;;  %s1024_s3 = inlined_call_operand.vmem [shape: f32[4,2,4,128], index: 3, kind: output, shape index: {}]  }
   0x1   :  { %s926_s14 = smov 0   ;;  %s928_s15 = smov 0  }
   0x2   :  { %s930_s16 = smov 0  }
   0x3 LB: > { %s28_s17 = sadd.s32 1, %s885_s14  ;;  %s32_s18 = sadd.s32 1, %s889_s15  ;;  %s893_s16 = sphi %s930_s16, %s13_s16   ;;  %s889_s15 = sphi %s928_s15, %s1028_s15   ;;  %s885_s14 = sphi %s926_s14, %s1027_s14   ;;  %s881_s13 = sphi %s924_s13, %s1026_s13   ;;  %s877_s12 = sphi %s922_s12, %s1025_s12  }
   0x4   : > { %p30_p0 = scmp.ge.s32.totalorder %s28_s17, 4  ;;  %p729_p1 = scmp.ge.s32.totalorder %s893_s16, 1 }
   0x5   : > { %p191_p2 = scmp.lt.s32.totalorder %s893_s16, 9 }
   0x6   : > { %s1030_s17 = smov (%p30_p0, %s28_s17), 0  ;;  %s1032_s18 = smov (!%p30_p0, %s32_s18), %s889_s15 }
   0x7   : > { %p192_p3 = pnand %p729_p1, %p191_p2  ;;  %p34_p4 = scmp.ge.s32.totalorder %s1032_s18, 2 }
   0x8   : > { %p238_p5 = scmp.lt.s32.totalorder (!%p192_p3), %s877_s12, 3  ;;  %p240_p6 = scmp.lt.s32.totalorder (!%p192_p3), %s881_s13, 1  ;;  %v895_v0 = vmov (!%p192_p3), 0.0   ;;  %vm896_vm0 = vmmov (!%p192_p3), 0   ;;  %vm284_vm1 = vcmask (!%p192_p3), 1041408   ;;  %vm280_vm2 = vcmask (!%p192_p3), 31744  }
   0x9   : > { %s1034_s18 = smov (%p34_p4, %s1032_s18), 0  ;;  %195 = sbr.rel (%p192_p3) target bundleno = 388 (0x184), region = 32 }
   0xa   : > { %762 = vmatprep.subr.bf16.mxu1 (!%p192_p3), %v895_v0  ;;  %764 = vmatprep.mubr.msk.bf16.mxu1 (!%p192_p3), %vm896_vm0, %v895_v0  ;;  %s897_s30 = smov (!%p192_p3), 125   ;;  %s898_s4 = smov (!%p192_p3), 126   ;;  %v901_v6 = vmov (!%p192_p3), 0   ;;  %vm475_vm3 = vcmask (!%p192_p3), 1022976   ;;  %vm410_vm4 = vcmask (!%p192_p3), 1031168   ;;  %vm345_vm5 = vcmask (!%p192_p3), 1039360  }
   0xb   : > { %774 = vmatprep.subr.bf16.mxu0 (!%p192_p3), %v895_v0  ;;  %776 = vmatprep.mubr.msk.bf16.mxu0 (!%p192_p3), %vm896_vm0, %v895_v0  ;;  %s899_s5 = smov (!%p192_p3), 127   ;;  %s900_s6 = smov (!%p192_p3), 124   ;;  %vm540_vm6 = vcmask (!%p192_p3), 1014784  }
   0xc   : > { %854 = vset.pattern.permute.xlu0 (!%p192_p3), %v901_v6 }
  0x10   : > { %s1036_s12 = smov (!%p238_p5, %s877_s12), 3  ;;  %s1038_s13 = smov (!%p240_p6, %s881_s13), 1 }
  0x11   : > { %s731_s19 = sshll.u32 %s1036_s12, 2  ;;  %s730_s20 = sshll.u32 %s1038_s13, 1 }
  0x12   : > { %s248_s21 = sadd.s32 %s731_s19, %s730_s20  ;;  %s806_s22 = smul.u32 10, %s1038_s13 }
  0x13   : > { %s732_s23 = sshll.u32 %s248_s21, 1  ;;  %s734_s7 = sshll.u32 %s1038_s13, 2 }
  0x14   : > { %s250_s26 = scalar_lea.vmem %s1021_s0, %s732_s23  ;;  %s971_s29 = scalar_lea.vmem %s1022_s1, %s806_s22 }
  0x15   : > { %v745_v1 = vld.sshfl [vmem:[%s250_s26] sm:$0x33 pattern:$0x76325410]  ;;  %s259_s10 = scalar_lea.vmem %s1023_s2, %s734_s7  ;;  %v741_v15 = vld [vmem:[%s971_s29 + $0x4] sm:$0x3] }
  0x16   : > { %v279_v2 = vld [vmem:[%s250_s26] sm:$0x3]  ;;  %471 = vrot.lane.b32.xlu1 %v745_v1, %s897_s30  ;;  %v470_v3 = vcombine.high %v745_v1, %v745_v1  ;;  %406 = vrot.lane.b32.xlu0 %v745_v1, %s898_s4  ;;  %v738_v21 = vld [vmem:[%s971_s29 + $0x2] sm:$0x3]  ;;  %s735_s11 = sshll.u32 %s1036_s12, 1 }
  0x17   : > { %v286_v4 = vsel %vm284_vm1, %v279_v2, 0  ;;  %v278_v5 = vld [vmem:[%s971_s29] sm:$0x3]  ;;  %v744_v25 = vld [vmem:[%s971_s29 + $0x6] sm:$0x3]  ;;  %s268_s19 = sadd.s32 %s735_s11, %s1038_s13 }
  0x18   : > { %763 = vmatpush3.bf16.msra.mxu1 %v286_v4  ;;  %v272_v7 = vld [vmem:[%s259_s10] sm:$0xf]  ;;  %v747_v27 = vld [vmem:[%s971_s29 + $0x8] sm:$0x3]  ;;  %s736_s20 = sshll.u32 %s268_s19, 2 }
  0x19   : > { %768 = vmatprep.subr.bf16.mxu1 %v895_v0  ;;  %s270_s23 = scalar_lea.vmem %s1024_s3, %s736_s20 }
  0x1a   : > { %473 = vrot.lane.b32.xlu1 %v470_v3, %s897_s30  ;;  %408 = vrot.lane.b32.xlu0 %v470_v3, %s898_s4 }
  0x1b   : > { %765 = vmatmul.mubr.msk.bf16.vlgmr.msra.gmra.mrb[0].mxu1 %vm280_vm2, %v278_v5 }
  0x1c   : > { %770 = vmatprep.mubr.msk.bf16.mxu1 %vm896_vm0, %v895_v0 }
  0x1e   : > { %341 = vrot.lane.b32.xlu0 %v745_v1, %s899_s5  ;;  %343 = vrot.lane.b32.xlu1 %v470_v3, %s899_s5 }
  0x22   : > { %536 = vrot.lane.b32.xlu0 %v745_v1, %s900_s6  ;;  %538 = vrot.lane.b32.xlu1 %v470_v3, %s900_s6 }
  0x26   : > { %275 = vperm.xlu0 %854, %v272_v7  }
  0x88   : > { %v472_v8 = vpop.permute.xlu1 %471  ;;  %v407_v9 = vpop.permute.xlu0 %406 }
  0x8c   : > { %v474_v10 = vpop.permute.xlu1 %473  ;;  %v409_v11 = vpop.permute.xlu0 %408 }
  0x8d   : > { %v476_v12 = vsel %vm475_vm3, %v472_v8, %v474_v10  ;;  %v411_v13 = vsel %vm410_vm4, %v407_v9, %v409_v11 }
  0x8e   : > { %v416_v14 = vsel %vm284_vm1, %v411_v13, 0  ;;  %v481_v16 = vsel %vm284_vm1, %v476_v12, 0 }
  0x8f   : > { %775 = vmatpush3.bf16.msra.mxu0 %v416_v14 }
  0x90   : > { %780 = vmatprep.subr.bf16.mxu0 %v895_v0  ;;  %v342_v17 = vpop.permute.xlu0 %341  ;;  %v344_v18 = vpop.permute.xlu1 %343 }
  0x91   : > { %v346_v19 = vsel %vm345_vm5, %v342_v17, %v344_v18 }
  0x92   : > { %777 = vmatmul.mubr.msk.bf16.vlgmr.msra.gmra.mrb[0].mxu0 %vm280_vm2, %v741_v15  ;;  %v351_v20 = vsel %vm284_vm1, %v346_v19, 0 }
  0x93   : > { %781 = vmatpush3.bf16.msra.mxu0 %v481_v16  ;;  %769 = vmatpush3.bf16.msra.mxu1 %v351_v20 }
  0x94   : > { %782 = vmatprep.mubr.msk.bf16.mxu0 %vm896_vm0, %v895_v0  ;;  %786 = vmatprep.subr.bf16.mxu0 %v895_v0  ;;  %v537_v22 = vpop.permute.xlu0 %536  ;;  %v539_v23 = vpop.permute.xlu1 %538 }
  0x95   : > { %v541_v24 = vsel %vm540_vm6, %v537_v22, %v539_v23 }
  0x96   : > { %771 = vmatmul.mubr.msk.bf16.vlgmr.msra.gmra.mrb[0].mxu1 %vm280_vm2, %v738_v21  ;;  %v546_v26 = vsel %vm284_vm1, %v541_v24, 0 }
  0x9e   : > { %783 = vmatmul.mubr.msk.bf16.vlgmr.msra.gmra.mrb[0].mxu0 %vm280_vm2, %v744_v25 }
  0x9f   : > { %787 = vmatpush3.bf16.msra.mxu0 %v546_v26  ;;  %788 = vmatprep.mubr.msk.bf16.mxu0 %vm896_vm0, %v895_v0 }
  0xa5   : > { %v276_v32 = vpop.permute.xlu0 %275 }
  0xaa   : > { %789 = vmatmul.mubr.msk.bf16.vlgmr.msra.gmra.mrb[0].mxu0 %vm280_vm2, %v747_v27 }
 0x169   : > { %v387_v28 = vpop.f32.mrb[0].mxu1 }
 0x16a   : > { %v772_v29 = vpop.f32.mrb[1].mxu1  ;;  %v792_v33 = vadd.f32 %v387_v28, %v276_v32 }
 0x16b   : > { %v390_v30 = vpop.f32.mrb[2].mxu1 }
 0x16c   : > { %v773_v31 = vpop.f32.mrb[3].mxu1 }
 0x17d   : > { %v582_v34 = vpop.f32.mrb[0].mxu0 }
 0x17e   : > { %v793_v35 = vadd.f32 %v792_v33, %v582_v34  ;;  %v790_v36 = vpop.f32.mrb[1].mxu0 }
 0x17f   : > { %v585_v37 = vpop.f32.mrb[2].mxu0 }
 0x180   : > { %vm589_vm7 = vcmp.ge.f32.partialorder %v793_v35, 0.0  ;;  %v590_v38 = vmul.f32 0.1, %v793_v35  ;;  %v791_v39 = vpop.f32.mrb[3].mxu0 }
 0x182   : > { %v591_v40 = vsel %vm589_vm7, %v793_v35, %v590_v38 }
 0x183   : > { %592 = vst [vmem:[%s270_s23] sm:$0xf] %v591_v40 }
 0x184 PF: > { %s13_s16 = sadd.s32 1, %s893_s16   ;;  %s1025_s12 = smov %s885_s14 }
 0x185   : > { %p10_p7 = scmp.ge.s32.totalorder %s13_s16, 10   ;;  %s1026_s13 = smov %s889_s15 }
 0x186   : > { %s1027_s14 = smov %s1030_s17  ;;  %s1028_s15 = smov %s1034_s18 }
 0x187   :  { %12 = sbr.rel (!%p10_p7) target bundleno = 3 (0x3), region = 72 }

// kernel: msd_forward.17
= control target key start
LH: loop header
LB: loop body
LE: loop exit
PB: predicated region body
PF: predicated region fallthrough
CT: control target
= control target key end

     0   :  { %s696_s14 = smov 0   ;;  %s698_s15 = smov 0   ;;  %s751_s0 = inlined_call_operand.vmem [shape: bf16[4,1,1,8,130], index: 0, kind: input, shape index: {}]   ;;  %s752_s1 = inlined_call_operand.vmem [shape: bf16[1,3,1,8], index: 1, kind: input, shape index: {}]   ;;  %s753_s2 = inlined_call_operand.<no memory space> [shape: f32[1,1,1], index: 2, kind: input, shape index: {}]   ;;  %s754_s3 = inlined_call_operand.vmem [shape: f32[4,1,1,128], index: 3, kind: output, shape index: {}]  }
   0x1   :  { %v8_v0 = vstv %s753_s2  ;;  %s700_s16 = smov 0  }
   0x2   :  { %9 = vst [vmem:[#allocation2] sm:$0x1] %v8_v0 }
   0x3 LB: > { %s30_s2 = sadd.s32 1, %s662_s15  ;;  %p569_p0 = scmp.ge.s32.totalorder %s666_s16, 1  ;;  %s666_s16 = sphi %s700_s16, %s15_s16   ;;  %s662_s15 = sphi %s698_s15, %s756_s15   ;;  %s658_s14 = sphi %s696_s14, %s755_s14  }
   0x4   : > { %p32_p1 = scmp.ge.s32.totalorder %s30_s2, 4  ;;  %p191_p2 = scmp.lt.s32.totalorder %s666_s16, 5 }
   0x6   : > { %s758_s2 = smov (%p32_p1, %s30_s2), 0  ;;  %p192_p3 = pnand %p569_p0, %p191_p2 }
   0x7   : > { %p234_p4 = scmp.lt.s32.totalorder (!%p192_p3), %s658_s14, 3  ;;  %v668_v1 = vmov (!%p192_p3), 0.0   ;;  %vm669_vm0 = vmmov (!%p192_p3), 0   ;;  %vm280_vm1 = vcmask (!%p192_p3), 1043456   ;;  %v274_v6 = vld [vmem:[%s752_s1] sm:$0x1] (!%p192_p3)  ;;  %v270_v24 = vlaneseq (!%p192_p3) }
   0x8   : > { %195 = sbr.rel (%p192_p3) target bundleno = 373 (0x175), region = 32  ;;  %594 = vmatprep.subr.bf16.mxu0 (!%p192_p3), %v668_v1  ;;  %588 = vmatprep.subr.bf16.mxu1 (!%p192_p3), %v668_v1  ;;  %s670_s23 = smov (!%p192_p3), 126   ;;  %vm276_vm2 = vcmask (!%p192_p3), 64512   ;;  %v672_v9 = vmov (!%p192_p3), 0   ;;  %vm392_vm3 = vcmask (!%p192_p3), 1031168   ;;  %vm337_vm4 = vcmask (!%p192_p3), 1039360  }
   0x9   : > { %596 = vmatprep.mubr.msk.bf16.mxu0 (!%p192_p3), %vm669_vm0, %v668_v1  ;;  %590 = vmatprep.mubr.msk.bf16.mxu1 (!%p192_p3), %vm669_vm0, %v668_v1  ;;  %s671_s24 = smov (!%p192_p3), 127   ;;  %v264_v8 = vld [vmem:[#allocation2] sm:$0x1] (!%p192_p3)  ;;  %v573_v17 = vld [vmem:[%s752_s1 + $0x1] sm:$0x1] (!%p192_p3)  ;;  %v271_v25 = vshrl.u32 (!%p192_p3), %v270_v24, 7 }
   0xa   : > { %641 = vset.pattern.permute.xlu0 (!%p192_p3), %v672_v9  ;;  %v577_v19 = vld [vmem:[%s752_s1 + $0x2] sm:$0x1] (!%p192_p3) }
   0xb   : > { %v272_v26 = vsub.s32 (!%p192_p3), 0, %v271_v25 }
   0xf   : > { %s760_s14 = smov (!%p234_p4, %s658_s14), 3 }
  0x10   : > { %s581_s17 = sshll.u32 %s760_s14, 3  ;;  %s262_s4 = scalar_lea.vmem %s754_s3, %s760_s14 }
  0x11   : > { %s246_s20 = scalar_lea.vmem %s751_s0, %s581_s17 }
  0x12   : > { %v327_v2 = vld [vmem:[%s246_s20] sm:$0xff] }
  0x13   : > { %v275_v3 = vld [vmem:[%s246_s20] sm:$0xf]  ;;  %v574_v4 = vcombine.low %v327_v2, %v327_v2  ;;  %v575_v7 = vcombine.high %v327_v2, %v327_v2 }
  0x14   : > { %v282_v5 = vsel %vm280_vm1, %v275_v3, 0 }
  0x15   : > { %589 = vmatpush3.bf16.msra.mxu1 %v282_v5  ;;  %388 = vrot.lane.b32.xlu1 %v574_v4, %s670_s23 }
  0x16   : > { %333 = vrot.lane.b32.xlu0 %v574_v4, %s671_s24 }
  0x18   : > { %591 = vmatmul.mubr.msk.bf16.vlgmr.msra.gmra.mrb[0].mxu1 %vm276_vm2, %v274_v6 }
  0x19   : > { %390 = vrot.lane.b32.xlu1 %v575_v7, %s670_s23 }
  0x1a   : > { %335 = vrot.lane.b32.xlu0 %v575_v7, %s671_s24 }
  0x1e   : > { %267 = vperm.xlu0 %641, %v264_v8  }
  0x87   : > { %v389_v10 = vpop.permute.xlu1 %388 }
  0x88   : > { %v334_v11 = vpop.permute.xlu0 %333 }
  0x8b   : > { %v391_v12 = vpop.permute.xlu1 %390 }
  0x8c   : > { %v336_v13 = vpop.permute.xlu0 %335  ;;  %v393_v14 = vsel %vm392_vm3, %v389_v10, %v391_v12 }
  0x8d   : > { %v338_v15 = vsel %vm337_vm4, %v334_v11, %v336_v13  ;;  %v398_v18 = vsel %vm280_vm1, %v393_v14, 0 }
  0x8e   : > { %v343_v16 = vsel %vm280_vm1, %v338_v15, 0 }
  0x8f   : > { %595 = vmatpush3.bf16.msra.mxu0 %v343_v16 }
  0x90   : > { %600 = vmatprep.subr.bf16.mxu0 %v668_v1 }
  0x92   : > { %597 = vmatmul.mubr.msk.bf16.vlgmr.msra.gmra.mrb[0].mxu0 %vm276_vm2, %v573_v17 }
  0x93   : > { %601 = vmatpush3.bf16.msra.mxu0 %v398_v18  ;;  %602 = vmatprep.mubr.msk.bf16.mxu0 %vm669_vm0, %v668_v1 }
  0x9d   : > { %v268_v27 = vpop.permute.xlu0 %267 }
  0x9e   : > { %603 = vmatmul.mubr.msk.bf16.vlgmr.msra.gmra.mrb[0].mxu0 %vm276_vm2, %v577_v19  ;;  %v273_v28 = vrot.slane %v268_v27, %v272_v26 }
  0xeb   : > { %v318_v20 = vpop.f32.mrb[0].mxu1 }
  0xec   : > { %v592_v21 = vpop.f32.mrb[1].mxu1  ;;  %v324_v29 = vadd.f32 %v318_v20, %v273_v28 }
  0xed   : > { %v321_v22 = vpop.f32.mrb[2].mxu1 }
  0xee   : > { %v593_v23 = vpop.f32.mrb[3].mxu1 }
 0x171   : > { %v434_v30 = vpop.f32.mrb[0].mxu0 }
 0x172   : > { %v607_v31 = vadd.f32 %v434_v30, %v324_v29  ;;  %v604_v32 = vpop.f32.mrb[1].mxu0 }
 0x173   : > { %v437_v33 = vpop.f32.mrb[2].mxu0 }
 0x174   : > { %441 = vst [vmem:[%s262_s4] sm:$0x1] %v607_v31  ;;  %v605_v34 = vpop.f32.mrb[3].mxu0 }
 0x175 PF: > { %s15_s16 = sadd.s32 1, %s666_s16   ;;  %s755_s14 = smov %s662_s15 }
 0x176   : > { %p12_p5 = scmp.ge.s32.totalorder %s15_s16, 6   ;;  %s756_s15 = smov %s758_s2 }
 0x178   :  { %14 = sbr.rel (!%p12_p5) target bundleno = 3 (0x3), region = 70 }

// kernel: msd_forward.18
= control target key start
LH: loop header
LB: loop body
LE: loop exit
PB: predicated region body
PF: predicated region fallthrough
CT: control target
= control target key end

     0   :  { %s312_s6 = smov 0   ;;  %s314_s7 = smov 0   ;;  %s345_s0 = inlined_call_operand.vmem [shape: f32[4,1,1,2,129], index: 0, kind: input, shape index: {}]   ;;  %s346_s1 = inlined_call_operand.vmem [shape: f32[4,1,128], index: 1, kind: output, shape index: {}]  }
   0x1   :  { %s316_s8 = smov 0  }
   0x2 LB: > { %s23_s9 = sadd.s32 1, %s295_s7  ;;  %p246_p0 = scmp.ge.s32.totalorder %s299_s8, 1  ;;  %s299_s8 = sphi %s316_s8, %s11_s8   ;;  %s295_s7 = sphi %s314_s7, %s348_s7   ;;  %s291_s6 = sphi %s312_s6, %s347_s6  }
   0x3   : > { %p25_p1 = scmp.ge.s32.totalorder %s23_s9, 4  ;;  %p107_p2 = scmp.lt.s32.totalorder %s299_s8, 5 }
   0x5   : > { %s350_s9 = smov (%p25_p1, %s23_s9), 0  ;;  %p108_p3 = pnand %p246_p0, %p107_p2 }
   0x6   : > { %p132_p4 = scmp.lt.s32.totalorder (!%p108_p3), %s291_s6, 3  ;;  %s301_s14 = smov (!%p108_p3), 127   ;;  %vm156_vm0 = vcmask (!%p108_p3), 1039360  }
   0x7   : > { %111 = sbr.rel (%p108_p3) target bundleno = 145 (0x91), region = 24 }
   0xe   : > { %s352_s6 = smov (!%p132_p4, %s291_s6), 3 }
   0xf   : > { %s251_s10 = sshll.u32 %s352_s6, 2  ;;  %s146_s17 = scalar_lea.vmem %s346_s1, %s352_s6 }
  0x10   : > { %s140_s13 = scalar_lea.vmem %s345_s0, %s251_s10 }
  0x11   : > { %v147_v0 = vld [vmem:[%s140_s13] sm:$0xf] }
  0x12   : > { %153 = vrot.lane.b32.xlu0 %v147_v0, %s301_s14  ;;  %v149_v1 = vrot.slane %v147_v0, 7 }
  0x14   : > { %v150_v2 = vrot.slane %v149_v1, 2 }
  0x16   : > { %v152_v3 = vadd.f32 %v150_v2, %v147_v0  ;;  %160 = vrot.lane.b32.xlu0 %v150_v2, %s301_s14 }
  0x84   : > { %v154_v4 = vpop.permute.xlu0 %153 }
  0x85   : > { %v155_v5 = vrot.slane %v154_v4, 2 }
  0x87   : > { %v157_v6 = vsel %vm156_vm0, %v154_v4, %v155_v5 }
  0x88   : > { %v161_v7 = vpop.permute.xlu0 %160  ;;  %v159_v9 = vadd.f32 %v157_v6, %v152_v3 }
  0x89   : > { %v162_v8 = vrot.slane %v161_v7, 2 }
  0x8b   : > { %v163_v10 = vsel %vm156_vm0, %v161_v7, %v162_v8 }
  0x8c   : > { %v165_v11 = vadd.f32 %v163_v10, %v159_v9 }
  0x8e   : > { %v166_v12 = vmul.f32 0.25, %v165_v11 }
  0x90   : > { %167 = vst [vmem:[%s146_s17] sm:$0x1] %v166_v12 }
  0x91 PF: > { %s11_s8 = sadd.s32 1, %s299_s8   ;;  %s347_s6 = smov %s295_s7 }
  0x92   : > { %p8_p5 = scmp.ge.s32.totalorder %s11_s8, 6   ;;  %s348_s7 = smov %s350_s9 }
  0x94   :  { %10 = sbr.rel (!%p8_p5) target bundleno = 2 (0x2), region = 54 }

</bundles_post_ra>
